<compile_context>
chip_gen: v7x
topology: tpu7x:2x2x1
jax: 0.10.0
libtpu: 0.0.40
codegen_flags: <defaults>
</compile_context>

<pallas_src>
import jax
import jax.numpy as jnp
from jax import lax
from jax.experimental import pallas as pl
from jax.experimental.pallas import tpu as pltpu


def attention_kernel(dec_ref, enc_ref, w_ref, attn_ref, sum_ref):
    dec = dec_ref[...].astype(jnp.float32)   # (B, H)
    enc = enc_ref[...].astype(jnp.float32)   # (B, S, H)
    w = w_ref[...].astype(jnp.float32)       # (H, H)  (rows = out, cols = in)

    # F.linear(dec, W) = dec @ W.T : contract dim 1 of dec with dim 1 of W.
    # Feeds the MXU directly; no transpose materialized.
    sub = lax.dot_general(dec, w, (((1,), (1,)), ((), ())),
                          preferred_element_type=jnp.float32)        # (B, H)
    sub = sub[:, None, :]                                            # (B, 1, H)

    # scores[b, 1, s] = sum_h sub[b, 1, h] * enc[b, s, h]   (batched MXU matmul)
    scores = jnp.einsum('bqh,bsh->bqs', sub, enc,
                        preferred_element_type=jnp.float32)          # (B, 1, S)

    # Numerically stable softmax over S.
    m = jnp.max(scores, axis=-1, keepdims=True)                      # (B, 1, 1)
    e = jnp.exp(scores - m)                                          # (B, 1, S)
    inv = pl.reciprocal(jnp.sum(e, axis=-1, keepdims=True), approx=True)
    p = e * inv                                                      # (B, 1, S)

    # out[b, 1, h] = sum_s p[b, 1, s] * enc[b, s, h]   (batched MXU matmul, "PV")
    out = jnp.einsum('bqs,bsh->bqh', p, enc,
                     preferred_element_type=jnp.float32)             # (B, 1, H)

    attn_ref[...] = p[:, 0, :].astype(attn_ref.dtype)                # (B, S) lane-dense
    sum_ref[...] = out[:, 0, :].astype(sum_ref.dtype)                # (B, H)


def attention_layer(decoder_feature, encoder_feature, W):
    B, H = decoder_feature.shape
    _, S, _ = encoder_feature.shape
    dtype = decoder_feature.dtype

    attn2d, sum_result = pl.pallas_call(
        attention_kernel,
        out_shape=(
            jax.ShapeDtypeStruct((B, S), dtype),
            jax.ShapeDtypeStruct((B, H), dtype),
        ),
        in_specs=[
            pl.BlockSpec(memory_space=pltpu.MemorySpace.VMEM),
            pl.BlockSpec(memory_space=pltpu.MemorySpace.VMEM),
            pl.BlockSpec(memory_space=pltpu.MemorySpace.VMEM),
        ],
        out_specs=(
            pl.BlockSpec(memory_space=pltpu.MemorySpace.VMEM),
            pl.BlockSpec(memory_space=pltpu.MemorySpace.VMEM),
        ),
    )(decoder_feature, encoder_feature, W)

    # PyTorch API returns attn with shape (B, 1, S); the reshape is free outside
    # the kernel and keeps the kernel's output store lane-dense.
    return attn2d[:, None, :], sum_result


def xavier_uniform(key, fan_in, fan_out, dtype=jnp.float32):
    # Matches torch.nn.init.xavier_uniform_ bound = sqrt(6 / (fan_in + fan_out))
    bound = (6.0 / (fan_in + fan_out)) ** 0.5
    return jax.random.uniform(key, (fan_out, fan_in), dtype=dtype,
                              minval=-bound, maxval=bound)


if __name__ == "__main__":
    B, S, H = 2, 8, 32  # batch, encoder seq len, HIDDEN_DIM

    key = jax.random.PRNGKey(0)
    k_w, k_dec, k_enc = jax.random.split(key, 3)

    # Parameter W: (encoderHiddendim, decoderHiddendim) = (H, H), xavier uniform.
    W = xavier_uniform(k_w, H, H)

    decoder_feature = jax.random.normal(k_dec, (B, H), dtype=jnp.float32)
    encoder_feature = jax.random.normal(k_enc, (B, S, H), dtype=jnp.float32)

    attn, sum_result = attention_layer(decoder_feature, encoder_feature, W)
    jax.block_until_ready((attn, sum_result))

    # Reference check in plain JAX (same math as the PyTorch forward).
    sub_ref = (decoder_feature @ W.T)[:, None, :]                       # (B, 1, H)
    scores_ref = jnp.einsum('bqh,bsh->bqs', sub_ref, encoder_feature)   # (B, 1, S)
    attn_ref = jax.nn.softmax(scores_ref, axis=2)
    sum_ref = jnp.einsum('bqs,bsh->bqh', attn_ref, encoder_feature)[:, 0, :]

    assert attn.shape == (B, 1, S) and sum_result.shape == (B, H)
    # Tolerance accounts for the EUP approximate reciprocal in the softmax denom.
    assert jnp.allclose(attn, attn_ref, atol=2e-3, rtol=2e-3)
    assert jnp.allclose(sum_result, sum_ref, atol=2e-3, rtol=2e-3)

    print("KERNEL_OK")
</pallas_src>

<mosaic_0001>
module attributes {stable_mosaic.version = 11 : i64} {
  func.func @attention_kernel(%arg0: memref<2x32xf32, #tpu.memory_space<vmem>>, %arg1: memref<2x8x32xf32, #tpu.memory_space<vmem>>, %arg2: memref<32x32xf32, #tpu.memory_space<vmem>>, %arg3: memref<2x8xf32, #tpu.memory_space<vmem>>, %arg4: memref<2x32xf32, #tpu.memory_space<vmem>>) attributes {dimension_semantics = [], scalar_prefetch = 0 : i64, scratch_operands = 0 : i64, tpu.core_type = #tpu.core_type<tc>} {
    %c0 = arith.constant 0 : index
    %c0_0 = arith.constant 0 : index
    %0 = vector.load %arg0[%c0, %c0_0] : memref<2x32xf32, #tpu.memory_space<vmem>>, vector<2x32xf32>
    %c0_1 = arith.constant 0 : index
    %c0_2 = arith.constant 0 : index
    %c0_3 = arith.constant 0 : index
    %1 = vector.load %arg1[%c0_1, %c0_2, %c0_3] : memref<2x8x32xf32, #tpu.memory_space<vmem>>, vector<2x8x32xf32>
    %c0_4 = arith.constant 0 : index
    %c0_5 = arith.constant 0 : index
    %2 = vector.load %arg2[%c0_4, %c0_5] : memref<32x32xf32, #tpu.memory_space<vmem>>, vector<32x32xf32>
    %cst = arith.constant dense<0.000000e+00> : vector<2x32xf32>
    %3 = tpu.matmul %0, %2, %cst {dimension_numbers = #tpu.dot_dimension_numbers<[1], [1], [0], [0], [0, 0, 1, 0], [], []>} : vector<2x32xf32>, vector<32x32xf32>, vector<2x32xf32> -> vector<2x32xf32>
    %4 = vector.shape_cast %3 : vector<2x32xf32> to vector<2x1x32xf32>
    "tpu.trace_start"() <{level = 10 : i32, message = "bqh,bsh->bqs"}> : () -> ()
    %cst_6 = arith.constant dense<0.000000e+00> : vector<2x1x8xf32>
    %5 = tpu.matmul %4, %1, %cst_6 {dimension_numbers = #tpu.dot_dimension_numbers<[2], [2], [1], [1], [0, 0, 0, 1, 1, 1], [0], [0]>} : vector<2x1x32xf32>, vector<2x8x32xf32>, vector<2x1x8xf32> -> vector<2x1x8xf32>
    "tpu.trace_stop"() : () -> ()
    %cst_7 = arith.constant dense<0xFF800000> : vector<2x1xf32>
    %6 = vector.multi_reduction <maximumf>, %5, %cst_7 [2] : vector<2x1x8xf32> to vector<2x1xf32>
    %7 = vector.shape_cast %6 : vector<2x1xf32> to vector<2x1x1xf32>
    %8 = vector.broadcast %7 : vector<2x1x1xf32> to vector<2x1x8xf32>
    %9 = arith.subf %5, %8 : vector<2x1x8xf32>
    %10 = math.exp %9 : vector<2x1x8xf32>
    %cst_8 = arith.constant dense<0.000000e+00> : vector<2x1xf32>
    %11 = vector.multi_reduction <add>, %10, %cst_8 [2] : vector<2x1x8xf32> to vector<2x1xf32>
    %12 = vector.shape_cast %11 : vector<2x1xf32> to vector<2x1x1xf32>
    %13 = tpu.reciprocal %12 {approx = true} : vector<2x1x1xf32> -> vector<2x1x1xf32>
    %14 = vector.broadcast %13 : vector<2x1x1xf32> to vector<2x1x8xf32>
    %15 = arith.mulf %10, %14 : vector<2x1x8xf32>
    "tpu.trace_start"() <{level = 10 : i32, message = "bqs,bsh->bqh"}> : () -> ()
    %cst_9 = arith.constant dense<0.000000e+00> : vector<2x1x32xf32>
    %16 = tpu.matmul %15, %1, %cst_9 {dimension_numbers = #tpu.dot_dimension_numbers<[2], [1], [1], [2], [0, 0, 0, 1, 1, 2], [0], [0]>} : vector<2x1x8xf32>, vector<2x8x32xf32>, vector<2x1x32xf32> -> vector<2x1x32xf32>
    "tpu.trace_stop"() : () -> ()
    %17 = vector.shape_cast %15 : vector<2x1x8xf32> to vector<2x8xf32>
    %c0_10 = arith.constant 0 : index
    %c0_11 = arith.constant 0 : index
    %18 = vector.load %arg3[%c0_10, %c0_11] : memref<2x8xf32, #tpu.memory_space<vmem>>, vector<2x8xf32>
    tpu.vector_store %arg3[%c0_10, %c0_11], %17 {strides = array<i32>} : memref<2x8xf32, #tpu.memory_space<vmem>>, vector<2x8xf32>,
    %19 = vector.shape_cast %16 : vector<2x1x32xf32> to vector<2x32xf32>
    %c0_12 = arith.constant 0 : index
    %c0_13 = arith.constant 0 : index
    %20 = vector.load %arg4[%c0_12, %c0_13] : memref<2x32xf32, #tpu.memory_space<vmem>>, vector<2x32xf32>
    tpu.vector_store %arg4[%c0_12, %c0_13], %19 {strides = array<i32>} : memref<2x32xf32, #tpu.memory_space<vmem>>, vector<2x32xf32>,
    return
  }
}

</mosaic_0001>

<bundles_post_ra>
// kernel: tpu_custom_call.1
= control target key start
LH: loop header
LB: loop body
LE: loop exit
PB: predicated region body
PF: predicated region fallthrough
CT: control target
= control target key end

     0   :  { %10 = vsyncpa [#allocation3], 0  ;;  %s865_s0 = inlined_call_operand.hbm [shape: f32[2,32], index: 0, kind: input, shape index: {}]   ;;  %s866_s1 = inlined_call_operand.hbm [shape: f32[2,8,32], index: 1, kind: input, shape index: {}]   ;;  %s867_s2 = inlined_call_operand.hbm [shape: f32[32,32], index: 2, kind: input, shape index: {}]   ;;  %s868_s3 = inlined_call_operand.hbm [shape: f32[2,8], index: 3, kind: output, shape index: {0}]   ;;  %s869_s4 = inlined_call_operand.hbm [shape: f32[2,32], index: 4, kind: output, shape index: {1}]  }
   0x1   :  { %11 = vsyncpa [#allocation6], 0 }
   0x2   :  { %12 = vsyncpa [#allocation4], 0 }
   0x3   :  { %13 = vsyncpa [#allocation10], 0  ;;  %s736_s15 = smov [#allocation5]   ;;  %s618_s19 = scalar_lea.hbm %s866_s1, 256 }
   0x4   :  { %s29_s16 = sshll.u32 %s736_s15, 4  ;;  %p619_p0 = scmp.ne.s32.totalorder %s866_s1, %s618_s19  ;;  %s30_s16 = int_to_ptr.vmem [resolvable:$true] %s29_s16 }
   0x5   :  { %p622_p1 = scmp.lt.u32.totalorder %s618_s19, %s866_s1 }
   0x7   :  { %p624_p2 = pnand %p622_p1, %p619_p0 }
   0x9   :  { %627 = shalt.err (!%p624_p2)
}
   0xa   :  { %s628_s24 = scalar_lea.vmem %s30_s16, 256  ;;  %p633_p4 = scmp.lt.s32.totalorder %s30_s16, %s30_s16 }
   0xb   :  { %p629_p3 = scmp.ne.s32.totalorder %s30_s16, %s628_s24  ;;  %p634_p5 = scmp.lt.s32.totalorder %s628_s24, %s628_s24 }
   0xd   :  { %p635_p6 = por %p634_p5, %p633_p4 }
   0xf   :  { %p636_p7 = pnand %p635_p6, %p629_p3 }
  0x11   :  { %639 = shalt.err (!%p636_p7)
}
  0x12   :  { %s737_s25 = smov 128   ;;  %s738_s26 = smov 8  }
  0x13   :  { %35 = dma.hbm_to_vmem [thread:$0]  %s866_s1, 256, %s30_s16, [#allocation6], %s737_s25, %s737_s25, %s738_s26  }
  0x14   :  { %s739_s29 = smov [#allocation2]   ;;  %s740_s5 = smov [#allocation7]  }
  0x15   :  { %s20_s30 = sshll.u32 %s739_s29, 4  ;;  %s41_s6 = sshll.u32 %s740_s5, 4  ;;  %s21_s30 = int_to_ptr.vmem [resolvable:$true] %s20_s30  ;;  %s42_s6 = int_to_ptr.vmem [resolvable:$true] %s41_s6 }
  0x16   :  { %s640_s9 = scalar_lea.hbm %s865_s0, 32 }
  0x17   :  { %p641_p8 = scmp.ne.s32.totalorder %s865_s0, %s640_s9  ;;  %p644_p9 = scmp.lt.u32.totalorder %s640_s9, %s865_s0 }
  0x19   :  { %p646_p10 = pnand %p644_p9, %p641_p8 }
  0x1b   :  { %649 = shalt.err (!%p646_p10)
}
  0x1c   :  { %s650_s1 = scalar_lea.vmem %s21_s30, 32  ;;  %p655_p12 = scmp.lt.s32.totalorder %s21_s30, %s21_s30 }
  0x1d   :  { %p651_p11 = scmp.ne.s32.totalorder %s21_s30, %s650_s1  ;;  %p656_p13 = scmp.lt.s32.totalorder %s650_s1, %s650_s1 }
  0x1f   :  { %p657_p0 = por %p656_p13, %p655_p12 }
  0x21   :  { %p658_p1 = pnand %p657_p0, %p651_p11 }
  0x23   :  { %661 = shalt.err (!%p658_p1)
}
  0x24   :  { %23 = dma.hbm_to_vmem [thread:$0]  %s865_s0, 32, %s21_s30, [#allocation3]  }
  0x25   :  { %s662_s18 = scalar_lea.hbm %s867_s2, 512 }
  0x26   :  { %p663_p2 = scmp.ne.s32.totalorder %s867_s2, %s662_s18  ;;  %p666_p3 = scmp.lt.u32.totalorder %s662_s18, %s867_s2 }
  0x28   :  { %p668_p4 = pnand %p666_p3, %p663_p2 }
  0x2a   :  { %671 = shalt.err (!%p668_p4)
}
  0x2b   :  { %s672_s23 = scalar_lea.vmem %s42_s6, 512  ;;  %p677_p6 = scmp.lt.s32.totalorder %s42_s6, %s42_s6 }
  0x2c   :  { %p673_p5 = scmp.ne.s32.totalorder %s42_s6, %s672_s23  ;;  %p678_p7 = scmp.lt.s32.totalorder %s672_s23, %s672_s23 }
  0x2e   :  { %p679_p8 = por %p678_p7, %p677_p6 }
  0x30   :  { %p680_p9 = pnand %p679_p8, %p673_p5 }
  0x32   :  { %683 = shalt.err (!%p680_p9)
}
  0x33   :  { %47 = dma.hbm_to_vmem [thread:$0]  %s867_s2, 512, %s42_s6, [#allocation6], %s737_s25, %s737_s25, %s738_s26  }
  0x34   :  { %728 = dma.done.wait [#allocation3], 32  }
  0x35   :  { %729 = vsyncadd [#allocation3], 4294967264 }
  0x36   :  { %730 = dma.done.wait [#allocation6], 768  }
  0x37   :  { %731 = vsyncadd [#allocation6], 4294966528  ;;  %v741_v0 = vmov 0.0|0.0   ;;  %vm742_vm0 = vmmov 0   ;;  %v743_v1 = vmov 0.0   ;;  %vm64_vm1 = vcmask 261120  }
  0x38   :  { %591 = vmatprep.subr.bf16.mxu0 %v741_v0  ;;  %568 = vmatprep.mubr.msk.f32.mxu0 %vm742_vm0, %v743_v1  ;;  %v60_v2 = vld [vmem:[#allocation7] sm:$0xff]  ;;  %v61_v3 = vld [vmem:[#allocation7 + $0x8] sm:$0xff]  ;;  %vm593_vm2 = vmpackc.low %vm64_vm1, %vm64_vm1  ;;  %v744_v10 = vmov 1966171168   ;;  %v154_v12 = vlaneseq  ;;  %vm323_vm3 = vcmask 57344   ;;  %vm346_vm4 = vcmask 64512  }
  0x39   :  { %571 = vmatprep.subr.mxu1 %v743_v1  ;;  %573 = vmatprep.mubr.msk.f32.mxu1 %vm742_vm0, %v743_v1  ;;  %v592_v4 = vpack.c.bf16 %v61_v3, %v60_v2  ;;  %v62_v5 = vld [vmem:[#allocation7 + $0x10] sm:$0xff]  ;;  %v63_v6 = vld [vmem:[#allocation7 + $0x18] sm:$0xff]  ;;  %v57_v8 = vld [vmem:[#allocation2] sm:$0x3]  ;;  %v152_v11 = vunpack.c.l.s4 %v744_v10  ;;  %vm494_vm5 = vcmask 1041409   ;;  %vm497_vm6 = vcmask 58368  }
  0x3a   :  { %v596_v7 = vpack.c.bf16 %v63_v6, %v62_v5  ;;  %v58_v9 = vld [vmem:[#allocation5] sm:$0xff]  ;;  %v155_v14 = vshrl.u32 %v154_v12, 7  ;;  %v59_v21 = vld [vmem:[#allocation5 + $0x8] sm:$0xff]  ;;  %s745_s2 = smov [#allocation8]  }
  0x3b   :  { %594 = vmatpush3.bf16.xpose.msk.msra.mxu0 %vm593_vm2, %v592_v4  ;;  %572 = vmatpush3.xpose.msk.msra.mxu1 %vm64_vm1, %v58_v9  ;;  %v153_v13 = vunpack.c.0.s8 %v152_v11  ;;  %s512_s25 = sshll.u32 %s745_s2, 4  ;;  %s513_s25 = int_to_ptr.vmem [resolvable:$true] %s512_s25 }
  0x3c   :  { %595 = vmatprep.subr.bf16.mxu0 %v741_v0  ;;  %576 = vmatprep.subr.mxu1 %v743_v1  ;;  %s684_s26 = scalar_lea.vmem %s513_s25, 32  ;;  %p689_p11 = scmp.lt.s32.totalorder %s513_s25, %s513_s25 }
  0x3d   :  { %v156_v15 = vsub.s32 %v153_v13, %v155_v14  ;;  %p685_p10 = scmp.ne.s32.totalorder %s513_s25, %s684_s26  ;;  %p690_p12 = scmp.lt.s32.totalorder %s684_s26, %s684_s26 }
  0x3f   :  { %p691_p13 = por %p690_p12, %p689_p11 }
  0x41   :  { %p692_p0 = pnand %p691_p13, %p685_p10 }
  0x43   :  { %598 = vmatpush3.bf16.xpose.msk.msra.mxu0 %vm593_vm2, %v596_v7 }
  0x4a   :  { %569 = vmatmul.mubr.msk.f32.vlgmr.msra.gmra.mrb[0].mxu0 %vm64_vm1, %v57_v8 }
 0x11d   :  { %v146_v16 = vpop.f32.mrb[0].mxu0 }
 0x11e   :  { %v157_v17 = vrot.slane %v146_v16, %v156_v15  ;;  %v570_v18 = vpop.f32.mrb[1].mxu0 }
 0x120   :  { %v158_v19 = vcombine.high %v157_v17, %v157_v17  ;;  %v165_v20 = vrot.slane %v157_v17, %v156_v15 }
 0x122   :  { %574 = vmatmul.mubr.msk.f32.vlgmr.msra.gmra.mrb[0].mxu1 %vm64_vm1, %v165_v20  ;;  %v172_v22 = vrot.slane %v158_v19, %v156_v15 }
 0x123   :  { %577 = vmatpush3.xpose.msk.msra.mxu1 %vm64_vm1, %v59_v21  ;;  %578 = vmatprep.mubr.msk.f32.mxu1 %vm742_vm0, %v743_v1 }
 0x124   :  { %581 = vmatprep.subr.mxu1 %v743_v1 }
 0x126   :  { %579 = vmatmul.mubr.msk.f32.vlgmr.msra.gmra.mrb[2].mxu1 %vm64_vm1, %v172_v22 }
 0x127   :  { %582 = vmatpush3.msra.mxu1 %v58_v9  ;;  %583 = vmatprep.mubr.msk.f32.mxu1 %vm742_vm0, %v743_v1 }
 0x128   :  { %586 = vmatprep.subr.mxu1 %v743_v1 }
 0x1f5   :  { %v244_v23 = vpop.f32.mrb[0].mxu1 }
 0x1f6   :  { %v575_v24 = vpop.f32.mrb[1].mxu1  ;;  %v324_v25 = vsel %vm323_vm3, %v244_v23, -inf }
 0x1f7   :  { %325 = vmax.xlane.f32.xlu0 %v324_v25 }
 0x1f9   :  { %v319_v26 = vpop.f32.mrb[2].mxu1 }
 0x1fa   :  { %v580_v27 = vpop.f32.mrb[3].mxu1  ;;  %v327_v28 = vsel %vm323_vm3, %v319_v26, -inf }
 0x1fb   :  { %328 = vmax.xlane.f32.xlu0 %v327_v28 }
 0x284   :  { %v326_v29 = vpop.xlane.xlu0 %325 }
 0x285   :  { %v330_v30 = vsub.f32 %v244_v23, %v326_v29 }
 0x287   :  { %v332_v31 = vmul.f32 1.442695, %v330_v30 }
 0x288   :  { %v329_v32 = vpop.xlane.xlu0 %328 }
 0x289   :  { %610 = vpow2.f32 %v332_v31  ;;  %v331_v33 = vsub.f32 %v319_v26, %v329_v32 }
 0x28b   :  { %v334_v34 = vmul.f32 1.442695, %v331_v33 }
 0x28d   :  { %612 = vpow2.f32 %v334_v34 }
 0x293   :  { %v611_v35 = vpop.eup %610 }
 0x294   :  { %v336_v36 = vsel %vm323_vm3, %v611_v35, 0.0 }
 0x295   :  { %337 = vadd.xlane.f32.xlu1 %v336_v36 }
 0x297   :  { %v613_v37 = vpop.eup %612 }
 0x298   :  { %v339_v38 = vsel %vm323_vm3, %v613_v37, 0.0 }
 0x299   :  { %340 = vadd.xlane.f32.xlu1 %v339_v38 }
 0x322   :  { %v338_v39 = vpop.xlane.xlu1 %337 }
 0x323   :  { %614 = vrcp.f32 %v338_v39 }
 0x326   :  { %v341_v40 = vpop.xlane.xlu1 %340 }
 0x327   :  { %616 = vrcp.f32 %v341_v40 }
 0x32d   :  { %v615_v41 = vpop.eup %614 }
 0x32e   :  { %v344_v42 = vmul.f32 %v615_v41, %v611_v35 }
 0x330   :  { %584 = vmatmul.mubr.msk.f32.vlgmr.msra.gmra.mrb[4].mxu1 %vm346_vm4, %v344_v42 }
 0x331   :  { %v617_v43 = vpop.eup %616  ;;  %587 = vmatpush3.msra.mxu1 %v59_v21  ;;  %588 = vmatprep.mubr.msk.f32.mxu1 %vm742_vm0, %v743_v1 }
 0x332   :  { %v345_v44 = vmul.f32 %v617_v43, %v613_v37 }
 0x334   :  { %589 = vmatmul.mubr.msk.f32.vlgmr.msra.gmra.mrb[6].mxu1 %vm346_vm4, %v345_v44  ;;  %v493_v45 = vrot.slane %v345_v44, 7 }
 0x336   :  { %v495_v46 = vsel %vm494_vm5, %v493_v45, %v344_v42 }
 0x337   :  { %498 = vst.msk [vmem:[#allocation8] sm:$0x3] %vm497_vm6, %v495_v46 }
 0x338   :  { %695 = shalt.err (!%p692_p0)
}
 0x339   :  { %s696_s29 = scalar_lea.hbm %s868_s3, 32 }
 0x33a   :  { %p697_p1 = scmp.ne.s32.totalorder %s868_s3, %s696_s29  ;;  %p700_p2 = scmp.lt.u32.totalorder %s696_s29, %s868_s3 }
 0x33c   :  { %p702_p3 = pnand %p700_p2, %p697_p1 }
 0x33e   :  { %705 = shalt.err (!%p702_p3)
}
 0x33f   :  { %515 = dma.vmem_to_hbm [thread:$0]  %s513_s25, 32, %s868_s3, [#allocation4]   ;;  %vm504_vm7 = vcmask 254976  }
 0x340   :  { %s746_s10 = smov [#allocation9]  }
 0x341   :  { %s522_s11 = sshll.u32 %s746_s10, 4  ;;  %s523_s11 = int_to_ptr.vmem [resolvable:$true] %s522_s11 }
 0x342   :  { %s706_s12 = scalar_lea.vmem %s523_s11, 32  ;;  %p711_p5 = scmp.lt.s32.totalorder %s523_s11, %s523_s11 }
 0x343   :  { %p707_p4 = scmp.ne.s32.totalorder %s523_s11, %s706_s12  ;;  %p712_p6 = scmp.lt.s32.totalorder %s706_s12, %s706_s12 }
 0x345   :  { %p713_p7 = por %p712_p6, %p711_p5 }
 0x347   :  { %p714_p8 = pnand %p713_p7, %p707_p4 }
 0x403   :  { %v416_v47 = vpop.f32.mrb[4].mxu1 }
 0x404   :  { %v585_v48 = vpop.f32.mrb[5].mxu1 }
 0x407   :  { %v489_v49 = vpop.f32.mrb[6].mxu1 }
 0x408   :  { %v501_v50 = vrot.slane %v489_v49, 7  ;;  %v590_v51 = vpop.f32.mrb[7].mxu1 }
 0x40a   :  { %v502_v52 = vsel %vm494_vm5, %v501_v50, %v416_v47 }
 0x40b   :  { %505 = vst.msk [vmem:[#allocation9] sm:$0x3] %vm504_vm7, %v502_v52 }
 0x40c   :  { %717 = shalt.err (!%p714_p8)
}
 0x40d   :  { %s718_s1 = scalar_lea.hbm %s869_s4, 32 }
 0x40e   :  { %p719_p9 = scmp.ne.s32.totalorder %s869_s4, %s718_s1  ;;  %p722_p10 = scmp.lt.u32.totalorder %s718_s1, %s869_s4 }
 0x410   :  { %p724_p11 = pnand %p722_p10, %p719_p9 }
 0x412   :  { %727 = shalt.err (!%p724_p11)
}
 0x413   :  { %525 = dma.vmem_to_hbm [thread:$0]  %s523_s11, 32, %s869_s4, [#allocation10]  }
 0x414   :  { %732 = dma.done.wait [#allocation4], 32  }
 0x415   :  { %733 = vsyncadd [#allocation4], 4294967264 }
 0x416   :  { %734 = dma.done.wait [#allocation10], 32  }
 0x417   :  { %735 = vsyncadd [#allocation10], 4294967264 }
 0x418   :  { %532 = vsyncpa [#allocation3], 1 }
 0x419   :  { %533 = vsyncpa [#allocation6], 1 }
 0x41a   :  { %534 = vsyncpa [#allocation4], 1 }
 0x41b   :  { %535 = vsyncpa [#allocation10], 1 }

</bundles_post_ra>
